<compile_context>
chip_gen: v7x
topology: tpu7x:2x2x1
jax: 0.10.0
libtpu: 0.0.40
codegen_flags: <defaults>
</compile_context>

<pallas_src>
import jax
import jax.numpy as jnp
from jax.experimental import pallas as pl
from jax.experimental.pallas import tpu as pltpu

NEG_INF = -1e30


# ------------------------------ fused kernel ------------------------------- #

def _make_fused_kernel(has_y: bool):
    def kernel(*refs):
        if has_y:
            (x_ref, wn_ref, asrc_ref, adst_ref, bconv_ref,
             ea_ref, ve_ref, S_ref, T_ref, Tt_ref, valid_ref,
             pool_ref, emb_ref, y_ref,
             w1p_ref, w1y_ref, b1_ref, w2_ref, b2_ref, o_ref) = refs
        else:
            (x_ref, wn_ref, asrc_ref, adst_ref, bconv_ref,
             ea_ref, ve_ref, S_ref, T_ref, Tt_ref, valid_ref,
             pool_ref, emb_ref,
             w1p_ref, b1_ref, w2_ref, b2_ref, o_ref) = refs
            y_ref = None
            w1y_ref = None

        # ---------------- GATConv (1 head, no self-loops) -----------------
        xp = jnp.dot(x_ref[...], wn_ref[...],
                     preferred_element_type=jnp.float32)                 # (N, C)
        S = S_ref[...]                                                    # (E, N) src one-hot
        T = T_ref[...]                                                    # (E, N) tgt one-hot
        valid = valid_ref[...]                                            # (E, 1)

        xp_src = jnp.dot(S, xp, preferred_element_type=jnp.float32)       # (E, C)
        xp_dst = jnp.dot(T, xp, preferred_element_type=jnp.float32)       # (E, C)
        a_src_e = jnp.sum(xp_src * asrc_ref[...], axis=-1, keepdims=True)  # (E, 1)
        a_dst_e = jnp.sum(xp_dst * adst_ref[...], axis=-1, keepdims=True)  # (E, 1)
        el_e = jnp.sum(ea_ref[...] * ve_ref[...], axis=-1, keepdims=True)  # (E, 1)

        s = a_src_e + a_dst_e + el_e
        s = jnp.where(s >= 0.0, s, 0.2 * s)                # LeakyReLU(0.2)
        s = jnp.where(valid > 0.0, s, NEG_INF)             # mask padded edges

        # per-target softmax over edges (exact even with duplicate edges)
        m_row = jnp.max(jnp.where(T > 0.0, s, NEG_INF), axis=0, keepdims=True)  # (1, N)
        m_e = jnp.sum(T * m_row, axis=-1, keepdims=True)                        # (E, 1)
        p = jnp.exp(s - m_e) * valid                                            # (E, 1)
        denom_row = jnp.sum(T * p, axis=0, keepdims=True)                       # (1, N)
        denom_e = jnp.sum(T * denom_row, axis=-1, keepdims=True)                # (E, 1)
        alpha = p / jnp.where(denom_e > 0.0, denom_e, 1.0)                      # (E, 1)

        out_x = jnp.dot(Tt_ref[...], alpha * xp_src,
                        preferred_element_type=jnp.float32) + bconv_ref[...]    # (N, C)

        # ------------- global_add_pool + empty-graph embedding -------------
        pooled = jnp.dot(pool_ref[...], out_x,
                         preferred_element_type=jnp.float32)                    # (B, C)
        is_empty = jnp.sum(pooled, axis=-1, keepdims=True) == 0.0
        pooled = jnp.where(is_empty, emb_ref[...], pooled)

        # -------- merged readout heads (stacked W1 / block-diag W2) --------
        z = jnp.dot(pooled, w1p_ref[...],
                    preferred_element_type=jnp.float32) + b1_ref[...]           # (B, H*hid)
        if has_y:
            z = z + jnp.dot(y_ref[...], w1y_ref[...],
                            preferred_element_type=jnp.float32)
        z = jnp.maximum(z, 0.0)
        o_ref[...] = jnp.dot(z, w2_ref[...],
                             preferred_element_type=jnp.float32) + b2_ref[...]  # (B, sum_out)

    return kernel


def _vmem_specs(n):
    return [pl.BlockSpec(memory_space=pltpu.MemorySpace.VMEM) for _ in range(n)]


# ------------------------------ module wrapper ------------------------------ #

class GNNRegressorPallas:
    """JAX/Pallas port of GNNRegressor with architecture_type='gat',
    gnn_params = {num_layers: 1, heads: 1, add_self_loops: False}."""

    def __init__(self, key, node_in_channels, edge_dim, gnn_out_channels,
                 readout_hidden_channels, out_properties, globals_dim=None):
        self.out_properties = (out_properties if isinstance(out_properties, list)
                               else [out_properties])
        self.no_model = (isinstance(out_properties, list)
                         and len(out_properties) == 1 and out_properties[0] == 1)
        self.using_y = globals_dim is not None
        if self.no_model:
            return

        C = gnn_out_channels
        G = globals_dim if self.using_y else 0
        readout_in = C + G
        H = len(self.out_properties)
        hid = readout_hidden_channels
        sum_out = sum(self.out_properties)
        ks = jax.random.split(key, 7 + 4 * H)

        def u(k, shape, scale=0.1):
            return jax.random.uniform(k, shape, jnp.float32, -scale, scale)

        # GATConv parameters (heads=1)
        self.w_node = u(ks[0], (node_in_channels, C))
        w_edge = u(ks[1], (edge_dim, C))
        self.att_src = u(ks[2], (1, C))
        self.att_dst = u(ks[3], (1, C))
        att_edge = u(ks[4], (1, C))
        self.conv_bias = u(ks[5], (1, C))
        # nn.Parameter(torch.rand(gnn_out_channels)) -> uniform [0, 1)
        self.empty_emb = jax.random.uniform(ks[6], (1, C), jnp.float32, 0.0, 1.0)
        # collapsed edge-attention projection: el_e = edge_attr_e . v_edge_row
        self.v_edge_row = att_edge @ w_edge.T                         # (1, edge_dim)

        # merged readout heads
        w1p_l, w1y_l, b1_l, b2_l = [], [], [], []
        w2_big = jnp.zeros((H * hid, sum_out), jnp.float32)
        off = 0
        for i, n_out in enumerate(self.out_properties):
            kw = ks[7 + 4 * i: 11 + 4 * i]
            w1 = u(kw[0], (readout_in, hid))
            b1 = u(kw[1], (1, hid))
            w2 = u(kw[2], (hid, n_out))
            b2 = u(kw[3], (1, n_out))
            w1p_l.append(w1[:C])
            if self.using_y:
                w1y_l.append(w1[C:])
            b1_l.append(b1)
            b2_l.append(b2)
            w2_big = w2_big.at[i * hid:(i + 1) * hid, off:off + n_out].set(w2)
            off += n_out
        self.w1p = jnp.concatenate(w1p_l, axis=1)                     # (C, H*hid)
        self.w1y = jnp.concatenate(w1y_l, axis=1) if self.using_y else None
        self.b1 = jnp.concatenate(b1_l, axis=1)                       # (1, H*hid)
        self.w2 = w2_big                                              # (H*hid, sum_out)
        self.b2 = jnp.concatenate(b2_l, axis=1)                       # (1, sum_out)

    def __call__(self, x, edge_index, edge_attr, batch=None, batch_size=None, y=None):
        if self.no_model:
            return jnp.ones((batch_size, 1), jnp.float32)

        N = x.shape[0]
        E = edge_index.shape[1]
        edge_dim = edge_attr.shape[1]
        E_pad = max(8, ((E + 7) // 8) * 8)
        src, tgt = edge_index[0], edge_index[1]
        eid = jnp.arange(E)

        # --- glue: O(E) scatters into one-hot incidence / pooling matrices ---
        # (data-dependent scatter stays in XLA; everything else runs in-kernel)
        S = jnp.zeros((E_pad, N), jnp.float32).at[eid, src].set(1.0)
        T = jnp.zeros((E_pad, N), jnp.float32).at[eid, tgt].set(1.0)
        Tt = jnp.zeros((N, E_pad), jnp.float32).at[tgt, eid].set(1.0)
        valid = (jnp.arange(E_pad) < E).astype(jnp.float32).reshape(E_pad, 1)
        ea = (jnp.zeros((E_pad, edge_dim), jnp.float32)
              .at[:E].set(edge_attr.astype(jnp.float32)))
        pool_mat = (jnp.zeros((batch_size, N), jnp.float32)
                    .at[batch, jnp.arange(N)].set(1.0))

        has_y = (y is not None) and self.using_y
        args = [x.astype(jnp.float32), self.w_node, self.att_src, self.att_dst,
                self.conv_bias, ea, self.v_edge_row, S, T, Tt, valid,
                pool_mat, self.empty_emb]
        if has_y:
            args += [y.astype(jnp.float32), self.w1p, self.w1y]
        else:
            args += [self.w1p]
        args += [self.b1, self.w2, self.b2]

        sum_out = sum(self.out_properties)
        out = pl.pallas_call(
            _make_fused_kernel(has_y),
            out_shape=jax.ShapeDtypeStruct((batch_size, sum_out), jnp.float32),
            in_specs=_vmem_specs(len(args)),
            out_specs=pl.BlockSpec(memory_space=pltpu.MemorySpace.VMEM),
        )(*args)

        # split the column-concatenated heads
        props = []
        off = 0
        for n_out in self.out_properties:
            p = out[:, off:off + n_out]
            off += n_out
            if n_out == 1:
                p = jnp.squeeze(p, axis=-1)
            props.append(p)
        return props if len(props) > 1 else props[0]


# ----------------------------------- main ----------------------------------- #

if __name__ == "__main__":
    key = jax.random.PRNGKey(0)
    k_model, k_x, k_e, k_ea, k_y = jax.random.split(key, 5)

    node_in_channels = 16
    edge_dim = 8
    gnn_out_channels = 32
    readout_hidden_channels = 32
    out_properties = [3, 1]       # two readout heads (second gets squeezed)
    globals_dim = 4

    N, E, B = 12, 24, 3           # graph 2 intentionally empty -> exercises empty-embedding path

    model = GNNRegressorPallas(k_model, node_in_channels, edge_dim,
                               gnn_out_channels, readout_hidden_channels,
                               out_properties, globals_dim=globals_dim)

    x = jax.random.normal(k_x, (N, node_in_channels), jnp.float32)
    # nodes 0..5 -> graph 0, nodes 6..11 -> graph 1 ; edges stay within graphs
    batch = jnp.array([0] * 6 + [1] * 6, jnp.int32)
    src = jax.random.randint(k_e, (E,), 0, 6)
    dst = jax.random.randint(jax.random.fold_in(k_e, 1), (E,), 0, 6)
    offs = jnp.where(jnp.arange(E) < E // 2, 0, 6)
    edge_index = jnp.stack([src + offs, dst + offs], axis=0).astype(jnp.int32)
    edge_attr = jax.random.normal(k_ea, (E, edge_dim), jnp.float32)
    y = jax.random.normal(k_y, (B, globals_dim), jnp.float32)

    out = model(x, edge_index, edge_attr, batch=batch, batch_size=B, y=y)
    out = jax.block_until_ready(out)

    assert isinstance(out, list) and len(out) == 2
    assert out[0].shape == (B, 3) and out[1].shape == (B,)
    assert all(bool(jnp.all(jnp.isfinite(o))) for o in out)
    print("KERNEL_OK")
</pallas_src>

<mosaic_0001>
module attributes {stable_mosaic.version = 11 : i64} {
  func.func @kernel(%arg0: memref<12x16xf32, #tpu.memory_space<vmem>>, %arg1: memref<16x32xf32, #tpu.memory_space<vmem>>, %arg2: memref<1x32xf32, #tpu.memory_space<vmem>>, %arg3: memref<1x32xf32, #tpu.memory_space<vmem>>, %arg4: memref<1x32xf32, #tpu.memory_space<vmem>>, %arg5: memref<24x8xf32, #tpu.memory_space<vmem>>, %arg6: memref<1x8xf32, #tpu.memory_space<vmem>>, %arg7: memref<24x12xf32, #tpu.memory_space<vmem>>, %arg8: memref<24x12xf32, #tpu.memory_space<vmem>>, %arg9: memref<12x24xf32, #tpu.memory_space<vmem>>, %arg10: memref<24x1xf32, #tpu.memory_space<vmem>>, %arg11: memref<3x12xf32, #tpu.memory_space<vmem>>, %arg12: memref<1x32xf32, #tpu.memory_space<vmem>>, %arg13: memref<3x4xf32, #tpu.memory_space<vmem>>, %arg14: memref<32x64xf32, #tpu.memory_space<vmem>>, %arg15: memref<4x64xf32, #tpu.memory_space<vmem>>, %arg16: memref<1x64xf32, #tpu.memory_space<vmem>>, %arg17: memref<64x4xf32, #tpu.memory_space<vmem>>, %arg18: memref<1x4xf32, #tpu.memory_space<vmem>>, %arg19: memref<3x4xf32, #tpu.memory_space<vmem>>) attributes {dimension_semantics = [], scalar_prefetch = 0 : i64, scratch_operands = 0 : i64, tpu.core_type = #tpu.core_type<tc>} {
    %c0 = arith.constant 0 : index
    %c0_0 = arith.constant 0 : index
    %0 = vector.load %arg0[%c0, %c0_0] : memref<12x16xf32, #tpu.memory_space<vmem>>, vector<12x16xf32>
    %c0_1 = arith.constant 0 : index
    %c0_2 = arith.constant 0 : index
    %1 = vector.load %arg1[%c0_1, %c0_2] : memref<16x32xf32, #tpu.memory_space<vmem>>, vector<16x32xf32>
    %cst = arith.constant dense<0.000000e+00> : vector<12x32xf32>
    %2 = tpu.matmul %0, %1, %cst {dimension_numbers = #tpu.dot_dimension_numbers<[1], [0], [0], [1], [0, 0, 1, 1], [], []>} : vector<12x16xf32>, vector<16x32xf32>, vector<12x32xf32> -> vector<12x32xf32>
    %c0_3 = arith.constant 0 : index
    %c0_4 = arith.constant 0 : index
    %3 = vector.load %arg7[%c0_3, %c0_4] : memref<24x12xf32, #tpu.memory_space<vmem>>, vector<24x12xf32>
    %c0_5 = arith.constant 0 : index
    %c0_6 = arith.constant 0 : index
    %4 = vector.load %arg8[%c0_5, %c0_6] : memref<24x12xf32, #tpu.memory_space<vmem>>, vector<24x12xf32>
    %c0_7 = arith.constant 0 : index
    %c0_8 = arith.constant 0 : index
    %5 = vector.load %arg10[%c0_7, %c0_8] : memref<24x1xf32, #tpu.memory_space<vmem>>, vector<24x1xf32>
    %cst_9 = arith.constant dense<0.000000e+00> : vector<24x32xf32>
    %6 = tpu.matmul %3, %2, %cst_9 {dimension_numbers = #tpu.dot_dimension_numbers<[1], [0], [0], [1], [0, 0, 1, 1], [], []>} : vector<24x12xf32>, vector<12x32xf32>, vector<24x32xf32> -> vector<24x32xf32>
    %cst_10 = arith.constant dense<0.000000e+00> : vector<24x32xf32>
    %7 = tpu.matmul %4, %2, %cst_10 {dimension_numbers = #tpu.dot_dimension_numbers<[1], [0], [0], [1], [0, 0, 1, 1], [], []>} : vector<24x12xf32>, vector<12x32xf32>, vector<24x32xf32> -> vector<24x32xf32>
    %c0_11 = arith.constant 0 : index
    %c0_12 = arith.constant 0 : index
    %8 = vector.load %arg2[%c0_11, %c0_12] : memref<1x32xf32, #tpu.memory_space<vmem>>, vector<1x32xf32>
    %9 = vector.broadcast %8 : vector<1x32xf32> to vector<24x32xf32>
    %10 = arith.mulf %6, %9 : vector<24x32xf32>
    %cst_13 = arith.constant dense<0.000000e+00> : vector<24xf32>
    %11 = vector.multi_reduction <add>, %10, %cst_13 [1] : vector<24x32xf32> to vector<24xf32>
    %12 = vector.shape_cast %11 : vector<24xf32> to vector<24x1xf32>
    %c0_14 = arith.constant 0 : index
    %c0_15 = arith.constant 0 : index
    %13 = vector.load %arg3[%c0_14, %c0_15] : memref<1x32xf32, #tpu.memory_space<vmem>>, vector<1x32xf32>
    %14 = vector.broadcast %13 : vector<1x32xf32> to vector<24x32xf32>
    %15 = arith.mulf %7, %14 : vector<24x32xf32>
    %cst_16 = arith.constant dense<0.000000e+00> : vector<24xf32>
    %16 = vector.multi_reduction <add>, %15, %cst_16 [1] : vector<24x32xf32> to vector<24xf32>
    %17 = vector.shape_cast %16 : vector<24xf32> to vector<24x1xf32>
    %c0_17 = arith.constant 0 : index
    %c0_18 = arith.constant 0 : index
    %18 = vector.load %arg5[%c0_17, %c0_18] : memref<24x8xf32, #tpu.memory_space<vmem>>, vector<24x8xf32>
    %c0_19 = arith.constant 0 : index
    %c0_20 = arith.constant 0 : index
    %19 = vector.load %arg6[%c0_19, %c0_20] : memref<1x8xf32, #tpu.memory_space<vmem>>, vector<1x8xf32>
    %20 = vector.broadcast %19 : vector<1x8xf32> to vector<24x8xf32>
    %21 = arith.mulf %18, %20 : vector<24x8xf32>
    %cst_21 = arith.constant dense<0.000000e+00> : vector<24xf32>
    %22 = vector.multi_reduction <add>, %21, %cst_21 [1] : vector<24x8xf32> to vector<24xf32>
    %23 = vector.shape_cast %22 : vector<24xf32> to vector<24x1xf32>
    %24 = arith.addf %12, %17 : vector<24x1xf32>
    %25 = arith.addf %24, %23 : vector<24x1xf32>
    %cst_22 = arith.constant 0.000000e+00 : f32
    %26 = vector.broadcast %cst_22 : f32 to vector<24x1xf32>
    %27 = arith.cmpf oge, %25, %26 : vector<24x1xf32>
    %cst_23 = arith.constant 2.000000e-01 : f32
    %28 = vector.broadcast %cst_23 : f32 to vector<24x1xf32>
    %29 = arith.mulf %28, %25 : vector<24x1xf32>
    %30 = arith.select %27, %25, %29 : vector<24x1xi1>, vector<24x1xf32>
    %cst_24 = arith.constant 0.000000e+00 : f32
    %31 = vector.broadcast %cst_24 : f32 to vector<24x1xf32>
    %32 = arith.cmpf ogt, %5, %31 : vector<24x1xf32>
    %cst_25 = arith.constant -1.000000e+30 : f32
    %33 = vector.broadcast %cst_25 : f32 to vector<24x1xf32>
    %34 = arith.select %32, %30, %33 : vector<24x1xi1>, vector<24x1xf32>
    %cst_26 = arith.constant 0.000000e+00 : f32
    %35 = vector.broadcast %cst_26 : f32 to vector<24x12xf32>
    %36 = arith.cmpf ogt, %4, %35 : vector<24x12xf32>
    %cst_27 = arith.constant -1.000000e+30 : f32
    %37 = vector.shape_cast %34 : vector<24x1xf32> to vector<24x1xf32>
    %38 = vector.broadcast %37 : vector<24x1xf32> to vector<24x12xf32>
    %39 = vector.broadcast %cst_27 : f32 to vector<24x12xf32>
    %40 = arith.select %36, %38, %39 : vector<24x12xi1>, vector<24x12xf32>
    %cst_28 = arith.constant dense<0xFF800000> : vector<12xf32>
    %41 = vector.multi_reduction <maximumf>, %40, %cst_28 [0] : vector<24x12xf32> to vector<12xf32>
    %42 = vector.shape_cast %41 : vector<12xf32> to vector<1x12xf32>
    %43 = vector.broadcast %42 : vector<1x12xf32> to vector<24x12xf32>
    %44 = arith.mulf %4, %43 : vector<24x12xf32>
    %cst_29 = arith.constant dense<0.000000e+00> : vector<24xf32>
    %45 = vector.multi_reduction <add>, %44, %cst_29 [1] : vector<24x12xf32> to vector<24xf32>
    %46 = vector.shape_cast %45 : vector<24xf32> to vector<24x1xf32>
    %47 = arith.subf %34, %46 : vector<24x1xf32>
    %48 = math.exp %47 : vector<24x1xf32>
    %49 = arith.mulf %48, %5 : vector<24x1xf32>
    %50 = vector.broadcast %49 : vector<24x1xf32> to vector<24x12xf32>
    %51 = arith.mulf %4, %50 : vector<24x12xf32>
    %cst_30 = arith.constant dense<0.000000e+00> : vector<12xf32>
    %52 = vector.multi_reduction <add>, %51, %cst_30 [0] : vector<24x12xf32> to vector<12xf32>
    %53 = vector.shape_cast %52 : vector<12xf32> to vector<1x12xf32>
    %54 = vector.broadcast %53 : vector<1x12xf32> to vector<24x12xf32>
    %55 = arith.mulf %4, %54 : vector<24x12xf32>
    %cst_31 = arith.constant dense<0.000000e+00> : vector<24xf32>
    %56 = vector.multi_reduction <add>, %55, %cst_31 [1] : vector<24x12xf32> to vector<24xf32>
    %57 = vector.shape_cast %56 : vector<24xf32> to vector<24x1xf32>
    %cst_32 = arith.constant 0.000000e+00 : f32
    %58 = vector.broadcast %cst_32 : f32 to vector<24x1xf32>
    %59 = arith.cmpf ogt, %57, %58 : vector<24x1xf32>
    %cst_33 = arith.constant 1.000000e+00 : f32
    %60 = vector.broadcast %cst_33 : f32 to vector<24x1xf32>
    %61 = arith.select %59, %57, %60 : vector<24x1xi1>, vector<24x1xf32>
    %62 = arith.divf %49, %61 : vector<24x1xf32>
    %c0_34 = arith.constant 0 : index
    %c0_35 = arith.constant 0 : index
    %63 = vector.load %arg9[%c0_34, %c0_35] : memref<12x24xf32, #tpu.memory_space<vmem>>, vector<12x24xf32>
    %64 = vector.broadcast %62 : vector<24x1xf32> to vector<24x32xf32>
    %65 = arith.mulf %64, %6 : vector<24x32xf32>
    %cst_36 = arith.constant dense<0.000000e+00> : vector<12x32xf32>
    %66 = tpu.matmul %63, %65, %cst_36 {dimension_numbers = #tpu.dot_dimension_numbers<[1], [0], [0], [1], [0, 0, 1, 1], [], []>} : vector<12x24xf32>, vector<24x32xf32>, vector<12x32xf32> -> vector<12x32xf32>
    %c0_37 = arith.constant 0 : index
    %c0_38 = arith.constant 0 : index
    %67 = vector.load %arg4[%c0_37, %c0_38] : memref<1x32xf32, #tpu.memory_space<vmem>>, vector<1x32xf32>
    %68 = vector.broadcast %67 : vector<1x32xf32> to vector<12x32xf32>
    %69 = arith.addf %66, %68 : vector<12x32xf32>
    %c0_39 = arith.constant 0 : index
    %c0_40 = arith.constant 0 : index
    %70 = vector.load %arg11[%c0_39, %c0_40] : memref<3x12xf32, #tpu.memory_space<vmem>>, vector<3x12xf32>
    %cst_41 = arith.constant dense<0.000000e+00> : vector<3x32xf32>
    %71 = tpu.matmul %70, %69, %cst_41 {dimension_numbers = #tpu.dot_dimension_numbers<[1], [0], [0], [1], [0, 0, 1, 1], [], []>} : vector<3x12xf32>, vector<12x32xf32>, vector<3x32xf32> -> vector<3x32xf32>
    %cst_42 = arith.constant dense<0.000000e+00> : vector<3xf32>
    %72 = vector.multi_reduction <add>, %71, %cst_42 [1] : vector<3x32xf32> to vector<3xf32>
    %73 = vector.shape_cast %72 : vector<3xf32> to vector<3x1xf32>
    %cst_43 = arith.constant 0.000000e+00 : f32
    %74 = vector.broadcast %cst_43 : f32 to vector<3x1xf32>
    %75 = arith.cmpf oeq, %73, %74 : vector<3x1xf32>
    %c0_44 = arith.constant 0 : index
    %c0_45 = arith.constant 0 : index
    %76 = vector.load %arg12[%c0_44, %c0_45] : memref<1x32xf32, #tpu.memory_space<vmem>>, vector<1x32xf32>
    %77 = vector.shape_cast %75 : vector<3x1xi1> to vector<3x1xi1>
    %78 = vector.broadcast %77 : vector<3x1xi1> to vector<3x32xi1>
    %79 = vector.shape_cast %76 : vector<1x32xf32> to vector<1x32xf32>
    %80 = vector.broadcast %79 : vector<1x32xf32> to vector<3x32xf32>
    %81 = arith.select %78, %80, %71 : vector<3x32xi1>, vector<3x32xf32>
    %c0_46 = arith.constant 0 : index
    %c0_47 = arith.constant 0 : index
    %82 = vector.load %arg14[%c0_46, %c0_47] : memref<32x64xf32, #tpu.memory_space<vmem>>, vector<32x64xf32>
    %cst_48 = arith.constant dense<0.000000e+00> : vector<3x64xf32>
    %83 = tpu.matmul %81, %82, %cst_48 {dimension_numbers = #tpu.dot_dimension_numbers<[1], [0], [0], [1], [0, 0, 1, 1], [], []>} : vector<3x32xf32>, vector<32x64xf32>, vector<3x64xf32> -> vector<3x64xf32>
    %c0_49 = arith.constant 0 : index
    %c0_50 = arith.constant 0 : index
    %84 = vector.load %arg16[%c0_49, %c0_50] : memref<1x64xf32, #tpu.memory_space<vmem>>, vector<1x64xf32>
    %85 = vector.broadcast %84 : vector<1x64xf32> to vector<3x64xf32>
    %86 = arith.addf %83, %85 : vector<3x64xf32>
    %c0_51 = arith.constant 0 : index
    %c0_52 = arith.constant 0 : index
    %87 = vector.load %arg13[%c0_51, %c0_52] : memref<3x4xf32, #tpu.memory_space<vmem>>, vector<3x4xf32>
    %c0_53 = arith.constant 0 : index
    %c0_54 = arith.constant 0 : index
    %88 = vector.load %arg15[%c0_53, %c0_54] : memref<4x64xf32, #tpu.memory_space<vmem>>, vector<4x64xf32>
    %cst_55 = arith.constant dense<0.000000e+00> : vector<3x64xf32>
    %89 = tpu.matmul %87, %88, %cst_55 {dimension_numbers = #tpu.dot_dimension_numbers<[1], [0], [0], [1], [0, 0, 1, 1], [], []>} : vector<3x4xf32>, vector<4x64xf32>, vector<3x64xf32> -> vector<3x64xf32>
    %90 = arith.addf %86, %89 : vector<3x64xf32>
    %cst_56 = arith.constant 0.000000e+00 : f32
    %91 = vector.broadcast %cst_56 : f32 to vector<3x64xf32>
    %92 = arith.maximumf %90, %91 : vector<3x64xf32>
    %c0_57 = arith.constant 0 : index
    %c0_58 = arith.constant 0 : index
    %93 = vector.load %arg17[%c0_57, %c0_58] : memref<64x4xf32, #tpu.memory_space<vmem>>, vector<64x4xf32>
    %cst_59 = arith.constant dense<0.000000e+00> : vector<3x4xf32>
    %94 = tpu.matmul %92, %93, %cst_59 {dimension_numbers = #tpu.dot_dimension_numbers<[1], [0], [0], [1], [0, 0, 1, 1], [], []>} : vector<3x64xf32>, vector<64x4xf32>, vector<3x4xf32> -> vector<3x4xf32>
    %c0_60 = arith.constant 0 : index
    %c0_61 = arith.constant 0 : index
    %95 = vector.load %arg18[%c0_60, %c0_61] : memref<1x4xf32, #tpu.memory_space<vmem>>, vector<1x4xf32>
    %96 = vector.broadcast %95 : vector<1x4xf32> to vector<3x4xf32>
    %97 = arith.addf %94, %96 : vector<3x4xf32>
    %c0_62 = arith.constant 0 : index
    %c0_63 = arith.constant 0 : index
    %98 = vector.load %arg19[%c0_62, %c0_63] : memref<3x4xf32, #tpu.memory_space<vmem>>, vector<3x4xf32>
    tpu.vector_store %arg19[%c0_62, %c0_63], %97 {strides = array<i32>} : memref<3x4xf32, #tpu.memory_space<vmem>>, vector<3x4xf32>,
    return
  }
}

</mosaic_0001>

<bundles_post_ra>
// kernel: tpu_custom_call.1
= control target key start
LH: loop header
LB: loop body
LE: loop exit
PB: predicated region body
PF: predicated region fallthrough
CT: control target
= control target key end

     0   :  { %s1595_s0 = inlined_call_operand.vmem [shape: f32[12,16], index: 0, kind: input, shape index: {}]   ;;  %s1596_s1 = inlined_call_operand.vmem [shape: f32[16,32], index: 1, kind: input, shape index: {}]   ;;  %s1597_s2 = inlined_call_operand.vmem [shape: f32[1,32], index: 2, kind: input, shape index: {}]   ;;  %s1598_s3 = inlined_call_operand.vmem [shape: f32[1,32], index: 3, kind: input, shape index: {}]   ;;  %s1599_s4 = inlined_call_operand.vmem [shape: f32[1,32], index: 4, kind: input, shape index: {}]   ;;  %s1600_s5 = inlined_call_operand.vmem [shape: f32[24,8], index: 5, kind: input, shape index: {}]   ;;  %s1601_s6 = inlined_call_operand.vmem [shape: f32[1,8], index: 6, kind: input, shape index: {}]   ;;  %s1602_s7 = inlined_call_operand.vmem [shape: f32[24,12], index: 7, kind: input, shape index: {}]   ;;  %s1603_s8 = inlined_call_operand.vmem [shape: f32[24,12], index: 8, kind: input, shape index: {}]   ;;  %s1604_s9 = inlined_call_operand.vmem [shape: f32[12,24], index: 9, kind: input, shape index: {}]   ;;  %s1605_s10 = inlined_call_operand.vmem [shape: f32[24,1], index: 10, kind: input, shape index: {}]   ;;  %s1606_s11 = inlined_call_operand.vmem [shape: f32[3,12], index: 11, kind: input, shape index: {}]   ;;  %s1607_s12 = inlined_call_operand.vmem [shape: f32[1,32], index: 12, kind: input, shape index: {}]   ;;  %s1608_s13 = inlined_call_operand.vmem [shape: f32[3,4], index: 13, kind: input, shape index: {}]   ;;  %s1609_s14 = inlined_call_operand.vmem [shape: f32[32,64], index: 14, kind: input, shape index: {}]   ;;  %s1610_s15 = inlined_call_operand.vmem [shape: f32[4,64], index: 15, kind: input, shape index: {}]   ;;  %s1611_s16 = inlined_call_operand.vmem [shape: f32[1,64], index: 16, kind: input, shape index: {}]   ;;  %s1612_s17 = inlined_call_operand.vmem [shape: f32[64,4], index: 17, kind: input, shape index: {}]   ;;  %s1613_s18 = inlined_call_operand.vmem [shape: f32[1,4], index: 18, kind: input, shape index: {}]   ;;  %s1614_s19 = inlined_call_operand.hbm [shape: f32[3,4], index: 19, kind: output, shape index: {}]  }
   0x1   :  { %1617 = sst [smem:[#allocation5_spill]] %s1595_s0 }
   0x2   :  { %1618 = sst [smem:[#allocation6_spill]] %s1596_s1 }
   0x3   :  { %1619 = sst [smem:[#allocation7_spill]] %s1597_s2 }
   0x4   :  { %1620 = sst [smem:[#allocation8_spill]] %s1598_s3 }
   0x5   :  { %s1621_s20 = sld [smem:[#allocation6_spill]]  ;;  %s1622_s23 = sld [smem:[#allocation5_spill]]  ;;  %vm67_vm0 = vcmask 130048  }
   0xb   :  { %v65_v0 = vld [vmem:[%s1621_s20] sm:$0xff]  ;;  %v66_v1 = vld [vmem:[%s1621_s20 + $0x8] sm:$0xff] }
   0xc   :  { %v63_v2 = vld [vmem:[%s1622_s23] sm:$0xff]  ;;  %v1151_v3 = vpack.c.bf16 %v66_v1, %v65_v0 }
   0xd   :  { %1071 = vmatprep.mubr.msk.f32.mxu1 %vm67_vm0, %v63_v2 }
   0xe   :  { %24 = vsyncpa [#allocation3], 0  ;;  %1152 = vmatprep.subr.bf16.mxu1 %v1151_v3  ;;  %v64_v4 = vld [vmem:[%s1622_s23 + $0x8] sm:$0xf]  ;;  %v1236_v5 = vmov 0.0|0.0   ;;  %vm1237_vm1 = vmmov 0  }
   0xf   :  { %1154 = vmatpush3.bf16.msra.mxu1 %v1151_v3  ;;  %1159 = vmatprep.subr.bf16.mxu0 %v1236_v5  ;;  %v1238_v6 = vmov 0.0   ;;  %v380_v7 = vld [vmem:[%s1600_s5] sm:$0xff]  ;;  %vm393_vm2 = vcmask 64512   ;;  %vm168_vm3 = vcmask 1043456   ;;  %vm1239_vm4 = vmmov 1   ;;  %v150_v17 = vld [vmem:[%s1602_s7 + $0x8] sm:$0xff] }
  0x10   :  { %1155 = vmatprep.subr.bf16.mxu1 %v1236_v5  ;;  %1091 = vmatprep.mubr.msk.f32.mxu0 %vm1237_vm1, %v1238_v6  ;;  %v1366_v8 = vld [vmem:[%s1601_s6] ss:$0 sm:$0xff]  ;;  %vm1371_vm5 = vmpackc.low %vm168_vm3, %vm1239_vm4  ;;  %vm158_vm6 = vcmask 97280   ;;  %v1401_v18 = vld [vmem:[%s1603_s8 + $0x8] sm:$0xff]  ;;  %s1625_s27 = sld [smem:[#allocation7_spill]]  ;;  %vm351_vm7 = vcmask 261120  }
  0x11   :  { %v390_v9 = vmul.f32 %v1366_v8, %v380_v7  ;;  %v149_v15 = vld [vmem:[%s1602_s7] sm:$0xff]  ;;  %v151_v19 = vld [vmem:[%s1602_s7 + $0x10] sm:$0xff]  ;;  %s1626_s7 = sld [smem:[#allocation8_spill]]  ;;  %v381_v37 = vld [vmem:[%s1600_s5 + $0x8] sm:$0xff]  ;;  %v1240_v53 = vmov 0   ;;  %s1241_s0 = smov [#allocation2]  }
  0x12   :  { %1072 = vmatmul.mubr.msk.f32.vlgmr.msra.gmra.mrb[0].mxu1 %vm67_vm0, %v64_v4  ;;  %v1385_v16 = vld [vmem:[%s1603_s8] sm:$0xff]  ;;  %v1416_v20 = vld [vmem:[%s1603_s8 + $0x10] sm:$0xff]  ;;  %v391_v47 = vmul.f32 %v1366_v8, %v381_v37  ;;  %1198 = vset.pattern.permute.xlu1 %v1240_v53  ;;  %v1463_v7 = vld [vmem:[%s1605_s10 + $0x8] sm:$0xff]  ;;  %vm425_vm0 = vcmp.gt.f32.partialorder %v1401_v18, 0.0  ;;  %s996_s30 = sshll.u32 %s1241_s0, 4  ;;  %s997_s30 = int_to_ptr.vmem [resolvable:$true] %s996_s30 }
  0x13   :  { %1078 = vmatprep.mubr.msk.f32.mxu1 %vm1237_vm1, %v1238_v6  ;;  %v394_v10 = vsel %vm393_vm2, %v390_v9, 0.0  ;;  %v382_v38 = vld [vmem:[%s1600_s5 + $0x10] sm:$0xff]  ;;  %1199 = vset.pattern.permute.xlu0 %v1240_v53  ;;  %v1457_v58 = vld [vmem:[%s1605_s10] sm:$0xff]  ;;  %vm419_vm10 = vcmp.gt.f32.partialorder %v1463_v7, 0.0  ;;  %vm424_vm14 = vcmp.gt.f32.partialorder %v1385_v16, 0.0  ;;  %vm426_vm15 = vcmp.gt.f32.partialorder %v1416_v20, 0.0  ;;  %p1217_p1 = scmp.lt.s32.totalorder %s997_s30, %s997_s30 }
  0x14   :  { %395 = vadd.xlane.f32.xlu0 %v394_v10  ;;  %v392_v48 = vmul.f32 %v1366_v8, %v382_v38  ;;  %v397_v51 = vsel %vm393_vm2, %v391_v47, 0.0  ;;  %vm418_vm9 = vcmp.gt.f32.partialorder %v1457_v58, 0.0  ;;  %v1468_v8 = vld [vmem:[%s1605_s10 + $0x10] sm:$0xff]  ;;  %v735_v13 = vld [vmem:[%s1609_s14 + $0x8] sm:$0xff] }
  0x15   :  { %vm420_vm11 = vcmp.gt.f32.partialorder %v1468_v8, 0.0 }
  0x16   :  { %v1014_v21 = vld [vmem:[%s1625_s27] ss:$0 sm:$0xff]  ;;  %v400_v52 = vsel %vm393_vm2, %v392_v48, 0.0 }
  0x17   :  { %v1015_v22 = vld [vmem:[%s1626_s7] ss:$0 sm:$0xff] }
  0xa1   :  { %v396_v54 = vpop.xlane.xlu0 %395 }
  0xe5   :  { %v1073_v11 = vpop.f32.mrb[0].mxu1 }
  0xe6   :  { %v140_v12 = vpop.f32.mrb[1].mxu1 }
  0xe7   :  { %v1156_v14 = vpack.c.bf16 %v1073_v11, %v140_v12 }
  0xe9   :  { %1158 = vmatpush3.bf16.msk.msra.mxu1 %vm1371_vm5, %v1156_v14  ;;  %1162 = vmatpush3.bf16.msk.msra.mxu0 %vm1371_vm5, %v1156_v14 }
  0xea   :  { %1167 = vmatprep.subr.bf16.mxu0 %v1236_v5 }
  0xec   :  { %1079 = vmatmul.mubr.msk.f32.vlgmr.msra.gmra.mrb[2].mxu1 %vm158_vm6, %v149_v15  ;;  %1092 = vmatmul.mubr.msk.f32.vlgmr.msra.gmra.mrb[0].mxu0 %vm158_vm6, %v1385_v16 }
  0xed   :  { %1081 = vmatprep.mubr.msk.f32.mxu1 %vm1237_vm1, %v1238_v6  ;;  %1094 = vmatprep.mubr.msk.f32.mxu0 %vm1237_vm1, %v1238_v6 }
  0xf0   :  { %1082 = vmatmul.mubr.msk.f32.gmra.mrb[4].mxu1 %vm158_vm6, %v150_v17  ;;  %1095 = vmatmul.mubr.msk.f32.gmra.mrb[2].mxu0 %vm158_vm6, %v1401_v18 }
  0xf1   :  { %1084 = vmatprep.mubr.msk.f32.mxu1 %vm1237_vm1, %v1238_v6  ;;  %1097 = vmatprep.mubr.msk.f32.mxu0 %vm1237_vm1, %v1238_v6 }
  0xf4   :  { %1085 = vmatmul.mubr.msk.f32.gmra.mrb[6].mxu1 %vm158_vm6, %v151_v19  ;;  %1098 = vmatmul.mubr.msk.f32.gmra.mrb[4].mxu0 %vm158_vm6, %v1416_v20 }
  0xf5   :  { %1113 = vmatprep.mubr.msk.f32.mxu0 %vm1237_vm1, %v1238_v6 }
 0x1bf   :  { %v1429_v23 = vpop.f32.mrb[2].mxu1  ;;  %v327_v24 = vpop.f32.mrb[0].mxu0 }
 0x1c0   :  { %v348_v25 = vmul.f32 %v1014_v21, %v1429_v23  ;;  %v368_v26 = vmul.f32 %v1015_v22, %v327_v24  ;;  %v1093_v27 = vpop.f32.mrb[1].mxu0  ;;  %v1080_v28 = vpop.f32.mrb[3].mxu1 }
 0x1c2   :  { %v371_v29 = vsel %vm351_vm7, %v368_v26, 0.0  ;;  %v352_v30 = vsel %vm351_vm7, %v348_v25, 0.0 }
 0x1c3   :  { %372 = vadd.xlane.f32.xlu1 %v371_v29  ;;  %v332_v31 = vpop.f32.mrb[2].mxu0  ;;  %353 = vadd.xlane.f32.xlu0 %v352_v30  ;;  %v1434_v32 = vpop.f32.mrb[4].mxu1 }
 0x1c4   :  { %v369_v33 = vmul.f32 %v1015_v22, %v332_v31  ;;  %v349_v34 = vmul.f32 %v1014_v21, %v1434_v32  ;;  %v1096_v35 = vpop.f32.mrb[3].mxu0  ;;  %v1083_v36 = vpop.f32.mrb[5].mxu1 }
 0x1c6   :  { %v374_v39 = vsel %vm351_vm7, %v369_v33, 0.0  ;;  %v355_v40 = vsel %vm351_vm7, %v349_v34, 0.0 }
 0x1c7   :  { %375 = vadd.xlane.f32.xlu1 %v374_v39  ;;  %v337_v41 = vpop.f32.mrb[4].mxu0  ;;  %356 = vadd.xlane.f32.xlu0 %v355_v40  ;;  %v1445_v42 = vpop.f32.mrb[6].mxu1 }
 0x1c8   :  { %v370_v43 = vmul.f32 %v1015_v22, %v337_v41  ;;  %v350_v44 = vmul.f32 %v1014_v21, %v1445_v42  ;;  %v1099_v45 = vpop.f32.mrb[5].mxu0  ;;  %v1086_v46 = vpop.f32.mrb[7].mxu1 }
 0x1ca   :  { %v377_v49 = vsel %vm351_vm7, %v370_v43, 0.0  ;;  %v358_v50 = vsel %vm351_vm7, %v350_v44, 0.0 }
 0x1cb   :  { %378 = vadd.xlane.f32.xlu1 %v377_v49  ;;  %359 = vadd.xlane.f32.xlu0 %v358_v50 }
 0x1cf   :  { %398 = vadd.xlane.f32.xlu1 %v397_v51  ;;  %401 = vadd.xlane.f32.xlu0 %v400_v52 }
 0x250   :  { %v373_v55 = vpop.xlane.xlu1 %372  ;;  %v354_v56 = vpop.xlane.xlu0 %353 }
 0x251   :  { %v403_v57 = vadd.f32 %v373_v55, %v354_v56 }
 0x253   :  { %v406_v59 = vadd.f32 %v403_v57, %v396_v54 }
 0x254   :  { %v376_v60 = vpop.xlane.xlu1 %375  ;;  %v357_v61 = vpop.xlane.xlu0 %356 }
 0x255   :  { %v412_v62 = vmul.f32 0.2, %v406_v59  ;;  %vm409_vm8 = vcmp.ge.f32.partialorder %v406_v59, 0.0  ;;  %v404_v3 = vadd.f32 %v376_v60, %v357_v61 }
 0x257   :  { %v415_v63 = vsel %vm409_vm8, %v406_v59, %v412_v62 }
 0x258   :  { %v379_v0 = vpop.xlane.xlu1 %378  ;;  %v360_v1 = vpop.xlane.xlu0 %359  ;;  %v421_v2 = vsel %vm418_vm9, %v415_v63, -1e+30  ;;  %vm560_vm9 = vcmask 195584  }
 0x259   :  { %429 = vperm.xlu1 %1198, %v421_v2   ;;  %v405_v4 = vadd.f32 %v379_v0, %v360_v1 }
 0x25c   :  { %v399_v9 = vpop.xlane.xlu1 %398  ;;  %v402_v10 = vpop.xlane.xlu0 %401 }
 0x25d   :  { %v407_v11 = vadd.f32 %v404_v3, %v399_v9  ;;  %v408_v12 = vadd.f32 %v405_v4, %v402_v10 }
 0x25f   :  { %v413_v14 = vmul.f32 0.2, %v407_v11  ;;  %v414_v15 = vmul.f32 0.2, %v408_v12  ;;  %vm410_vm12 = vcmp.ge.f32.partialorder %v407_v11, 0.0  ;;  %vm411_vm13 = vcmp.ge.f32.partialorder %v408_v12, 0.0 }
 0x261   :  { %v416_v17 = vsel %vm410_vm12, %v407_v11, %v413_v14  ;;  %v417_v19 = vsel %vm411_vm13, %v408_v12, %v414_v15 }
 0x262   :  { %v422_v21 = vsel %vm419_vm10, %v416_v17, -1e+30  ;;  %v423_v22 = vsel %vm420_vm11, %v417_v19, -1e+30  ;;  %vm820_vm10 = vcmask 31744  }
 0x263   :  { %434 = vperm.xlu0 %1199, %v422_v21   ;;  %439 = vperm.xlu1 %1198, %v423_v22  }
 0x2d8   :  { %v430_v24 = vpop.permute.xlu1 %429 }
 0x2d9   :  { %v442_v25 = vsel %vm424_vm14, %v430_v24, -1e+30 }
 0x2da   :  { %v445_v30 = vsel %vm158_vm6, %v442_v25, -inf }
 0x2e2   :  { %v440_v26 = vpop.permute.xlu1 %439  ;;  %v435_v27 = vpop.permute.xlu0 %434 }
 0x2e3   :  { %v444_v28 = vsel %vm426_vm15, %v440_v26, -1e+30  ;;  %v443_v29 = vsel %vm425_vm0, %v435_v27, -1e+30 }
 0x2e4   :  { %v446_v31 = vsel %vm158_vm6, %v443_v29, -inf  ;;  %v447_v34 = vsel %vm158_vm6, %v444_v28, -inf }
 0x2e5   :  { %v448_v33 = vmax.f32 %v445_v30, %v446_v31 }
 0x2e7   :  { %v449_v35 = vmax.f32 %v448_v33, %v447_v34 }
 0x2e9   :  { %v450_v36 = vrot.slane %v449_v35, 4 }
 0x2eb   :  { %v451_v37 = vmax.f32 %v449_v35, %v450_v36 }
 0x2ed   :  { %v452_v38 = vrot.slane %v451_v37, 2 }
 0x2ef   :  { %v453_v39 = vmax.f32 %v451_v37, %v452_v38 }
 0x2f1   :  { %v454_v40 = vrot.slane %v453_v39, 1 }
 0x2f3   :  { %v455_v41 = vmax.f32 %v453_v39, %v454_v40  ;;  %v533_v40 = vld [vmem:[%s1604_s9] sm:$0xff] }
 0x2f4   :  { %1106 = vmatprep.mubr.msk.f32.mxu1 %vm560_vm9, %v533_v40 }
 0x2f5   :  { %v457_v43 = vmul.f32 %v455_v41, %v1401_v18  ;;  %v456_v44 = vmul.f32 %v455_v41, %v1385_v16  ;;  %v458_v47 = vmul.f32 %v455_v41, %v1416_v20 }
 0x2f7   :  { %v462_v45 = vsel %vm158_vm6, %v457_v43, 0.0  ;;  %v459_v46 = vsel %vm158_vm6, %v456_v44, 0.0  ;;  %v465_v48 = vsel %vm158_vm6, %v458_v47, 0.0 }
 0x2f8   :  { %463 = vadd.xlane.f32.xlu0 %v462_v45  ;;  %460 = vadd.xlane.f32.xlu1 %v459_v46 }
 0x2fc   :  { %466 = vadd.xlane.f32.xlu1 %v465_v48 }
 0x385   :  { %v464_v49 = vpop.xlane.xlu0 %463  ;;  %v461_v50 = vpop.xlane.xlu1 %460 }
 0x386   :  { %v469_v51 = vsub.f32 %v422_v21, %v464_v49  ;;  %v468_v52 = vsub.f32 %v421_v2, %v461_v50  ;;  %v534_v49 = vld [vmem:[%s1604_s9 + $0x8] sm:$0xf] }
 0x388   :  { %v471_v53 = vmul.f32 1.442695, %v468_v52  ;;  %v473_v54 = vmul.f32 1.442695, %v469_v51 }
 0x389   :  { %v467_v55 = vpop.xlane.xlu1 %466 }
 0x38a   :  { %v470_v56 = vsub.f32 %v423_v22, %v467_v55  ;;  %1200 = vpow2.f32 %v471_v53  ;;  %v642_v53 = vld [vmem:[%s1606_s11] sm:$0x7]  ;;  %v736_v55 = vld [vmem:[%s1609_s14 + $0x10] sm:$0xff] }
 0x38b   :  { %1202 = vpow2.f32 %v473_v54  ;;  %v734_v54 = vld [vmem:[%s1609_s14] sm:$0xff] }
 0x38c   :  { %v475_v57 = vmul.f32 1.442695, %v470_v56  ;;  %v1172_v56 = vpack.c.bf16 %v735_v13, %v734_v54 }
 0x38e   :  { %1204 = vpow2.f32 %v475_v57  ;;  %v737_v57 = vld [vmem:[%s1609_s14 + $0x18] sm:$0xff] }
 0x394   :  { %v1201_v59 = vpop.eup %1200 }
 0x395   :  { %v477_v60 = vmul.f32 %v1201_v59, %v1457_v58  ;;  %v1203_v61 = vpop.eup %1202  ;;  %v1175_v59 = vpack.c.bf16 %v737_v57, %v736_v55 }
 0x396   :  { %v478_v0 = vmul.f32 %v1203_v61, %v1463_v7 }
 0x397   :  { %482 = vperm.xlu1 %1198, %v477_v60  }
 0x398   :  { %v1205_v62 = vpop.eup %1204 }
 0x399   :  { %v479_v63 = vmul.f32 %v1205_v62, %v1468_v8 }
 0x39b   :  { %492 = vperm.xlu0 %1199, %v479_v63   ;;  %487 = vperm.xlu1 %1198, %v478_v0  }
 0x416   :  { %v483_v1 = vpop.permute.xlu1 %482 }
 0x417   :  { %v495_v2 = vmul.f32 %v483_v1, %v1385_v16  ;;  %v901_v1 = vld [vmem:[%s1612_s17 + $0x10] sm:$0xff] }
 0x419   :  { %v498_v58 = vsel %vm158_vm6, %v495_v2, 0.0 }
 0x41a   :  { %v493_v3 = vpop.permute.xlu0 %492  ;;  %v488_v4 = vpop.permute.xlu1 %487 }
 0x41b   :  { %v497_v9 = vmul.f32 %v493_v3, %v1416_v20  ;;  %v496_v10 = vmul.f32 %v488_v4, %v1401_v18  ;;  %v902_v3 = vld [vmem:[%s1612_s17 + $0x18] sm:$0xff] }
 0x41c   :  { %v1181_v4 = vpack.c.bf16 %v902_v3, %v901_v1 }
 0x41d   :  { %v499_v11 = vsel %vm158_vm6, %v496_v10, 0.0  ;;  %v501_v8 = vsel %vm158_vm6, %v497_v9, 0.0  ;;  %v903_v9 = vld [vmem:[%s1612_s17 + $0x20] sm:$0xff]  ;;  %v904_v10 = vld [vmem:[%s1612_s17 + $0x28] sm:$0xff] }
 0x41e   :  { %v500_v12 = vadd.f32 %v499_v11, %v498_v58  ;;  %v1184_v58 = vpack.c.bf16 %v904_v10, %v903_v9  ;;  %v1022_v11 = vld [vmem:[%s1607_s12] ss:$0 sm:$0xff] }
 0x420   :  { %v502_v14 = vadd.f32 %v501_v8, %v500_v12  ;;  %v819_v8 = vld [vmem:[%s1610_s15] sm:$0xf] }
 0x422   :  { %v503_v7 = vrot.slane %v502_v14, 4 }
 0x424   :  { %v504_v15 = vadd.f32 %v503_v7, %v502_v14  ;;  %v905_v7 = vld [vmem:[%s1612_s17 + $0x30] sm:$0xff] }
 0x426   :  { %v505_v17 = vrot.slane %v504_v15, 2 }
 0x428   :  { %v506_v19 = vadd.f32 %v505_v17, %v504_v15  ;;  %v906_v15 = vld [vmem:[%s1612_s17 + $0x38] sm:$0xff] }
 0x429   :  { %v1187_v17 = vpack.c.bf16 %v906_v15, %v905_v7 }
 0x42a   :  { %v507_v21 = vrot.slane %v506_v19, 1 }
 0x42c   :  { %v508_v22 = vadd.f32 %v507_v21, %v506_v19 }
 0x42e   :  { %v510_v24 = vmul.f32 %v508_v22, %v1401_v18  ;;  %v509_v25 = vmul.f32 %v508_v22, %v1385_v16  ;;  %v511_v28 = vmul.f32 %v508_v22, %v1416_v20 }
 0x430   :  { %v515_v26 = vsel %vm158_vm6, %v510_v24, 0.0  ;;  %v512_v27 = vsel %vm158_vm6, %v509_v25, 0.0  ;;  %v518_v29 = vsel %vm158_vm6, %v511_v28, 0.0  ;;  %v1027_v25 = vld [vmem:[%s1613_s18] ss:$0 sm:$0xff] }
 0x431   :  { %516 = vadd.xlane.f32.xlu0 %v515_v26  ;;  %513 = vadd.xlane.f32.xlu1 %v512_v27 }
 0x435   :  { %519 = vadd.xlane.f32.xlu1 %v518_v29 }
 0x4be   :  { %v517_v30 = vpop.xlane.xlu0 %516  ;;  %v514_v31 = vpop.xlane.xlu1 %513 }
 0x4bf   :  { %vm522_vm2 = vcmp.gt.f32.partialorder %v517_v30, 0.0  ;;  %vm521_vm4 = vcmp.gt.f32.partialorder %v514_v31, 0.0 }
 0x4c0   :  { %v525_v33 = vsel %vm522_vm2, %v517_v30, 1.0  ;;  %v524_v34 = vsel %vm521_vm4, %v514_v31, 1.0 }
 0x4c1   :  { %1206 = vrcp.f32 %v525_v33 }
 0x4c2   :  { %1208 = vrcp.f32 %v524_v34  ;;  %v520_v16 = vpop.xlane.xlu1 %519 }
 0x4c3   :  { %vm523_vm8 = vcmp.gt.f32.partialorder %v520_v16, 0.0 }
 0x4c4   :  { %v526_v18 = vsel %vm523_vm8, %v520_v16, 1.0 }
 0x4c5   :  { %1210 = vrcp.f32 %v526_v18 }
 0x4cb   :  { %v1207_v35 = vpop.eup %1206 }
 0x4cc   :  { %v1209_v36 = vpop.eup %1208  ;;  %v530_v20 = vmul.f32 %v1207_v35, %v478_v0  ;;  %v900_v0 = vld [vmem:[%s1612_s17 + $0x8] sm:$0xff] }
 0x4cd   :  { %v528_v37 = vmul.f32 %v1209_v36, %v477_v60 }
 0x4ce   :  { %542 = vperm.xlu0 %1199, %v530_v20  }
 0x4cf   :  { %v1211_v38 = vpop.eup %1210  ;;  %537 = vperm.xlu1 %1198, %v528_v37  }
 0x4d0   :  { %v532_v39 = vmul.f32 %v1211_v38, %v479_v63  ;;  %v899_v63 = vld [vmem:[%s1612_s17] sm:$0xff]  ;;  %s1212_s17 = scalar_lea.vmem %s997_s30, 64 }
 0x4d1   :  { %v1178_v2 = vpack.c.bf16 %v900_v0, %v899_v63  ;;  %p1213_p0 = scmp.ne.s32.totalorder %s997_s30, %s1212_s17  ;;  %p1218_p2 = scmp.lt.s32.totalorder %s1212_s17, %s1212_s17 }
 0x4d3   :  { %547 = vperm.xlu1 %1198, %v532_v39   ;;  %p1219_p3 = por %p1218_p2, %p1217_p1 }
 0x4d5   :  { %p1220_p4 = pnand %p1219_p3, %p1213_p0 }
 0x54d   :  { %v543_v41 = vpop.permute.xlu0 %542 }
 0x54e   :  { %v551_v43 = vmul.f32 %v543_v41, %v1434_v32  ;;  %v538_v44 = vpop.permute.xlu1 %537 }
 0x54f   :  { %v550_v45 = vmul.f32 %v538_v44, %v1429_v23  ;;  %v1017_v23 = vld [vmem:[%s1599_s4] ss:$0 sm:$0xff] }
 0x551   :  { %v1163_v46 = vpack.c.bf16 %v551_v43, %v550_v45 }
 0x552   :  { %v548_v47 = vpop.permute.xlu1 %547 }
 0x553   :  { %v552_v48 = vmul.f32 %v548_v47, %v1445_v42  ;;  %1164 = vmatprep.subr.bf16.mxu1 %v1163_v46 }
 0x554   :  { %1166 = vmatpush3.bf16.msra.mxu1 %v1163_v46 }
 0x555   :  { %1104 = vmatprep.subr.mxu1 %v552_v48 }
 0x558   :  { %1105 = vmatpush3.msra.mxu1 %v552_v48 }
 0x559   :  { %1107 = vmatmul.mubr.msk.f32.vlgmr.msra.gmra.mrb[8].mxu1 %vm560_vm9, %v534_v49  ;;  %1171 = vmatprep.subr.bf16.mxu1 %v1236_v5 }
 0x55a   :  { %1124 = vmatprep.mubr.msk.f32.mxu1 %vm1237_vm1, %v1238_v6  ;;  %1173 = vmatpush3.bf16.msra.mxu1 %v1172_v56 }
 0x55b   :  { %1174 = vmatprep.subr.bf16.mxu1 %v1236_v5 }
 0x55e   :  { %1176 = vmatpush3.bf16.msra.mxu1 %v1175_v59 }
 0x55f   :  { %1127 = vmatprep.subr.mxu1 %v1238_v6 }
 0x62c   :  { %v1108_v32 = vpop.f32.mrb[8].mxu1 }
 0x62d   :  { %v639_v42 = vadd.f32 %v1108_v32, %v1017_v23  ;;  %v633_v50 = vpop.f32.mrb[9].mxu1 }
 0x62e   :  { %v634_v51 = vadd.f32 %v1017_v23, %v633_v50 }
 0x630   :  { %v1168_v52 = vpack.c.bf16 %v639_v42, %v634_v51 }
 0x632   :  { %1170 = vmatpush3.bf16.msk.msra.mxu0 %vm1371_vm5, %v1168_v52  ;;  %vm719_vm5 = vcmask 256000  }
 0x633   :  { %1177 = vmatprep.subr.bf16.mxu0 %v1236_v5 }
 0x635   :  { %1114 = vmatmul.mubr.msk.f32.vlgmr.msra.gmra.mrb[6].mxu0 %vm158_vm6, %v642_v53 }
 0x636   :  { %1148 = vmatprep.mubr.msk.f32.mxu0 %vm1237_vm1, %v1238_v6  ;;  %1179 = vmatpush3.bf16.msra.mxu0 %v1178_v2 }
 0x637   :  { %1180 = vmatprep.subr.bf16.mxu0 %v1236_v5 }
 0x63a   :  { %1182 = vmatpush3.bf16.msra.mxu0 %v1181_v4 }
 0x63b   :  { %1183 = vmatprep.subr.bf16.mxu0 %v1236_v5 }
 0x63e   :  { %1185 = vmatpush3.bf16.msra.mxu0 %v1184_v58 }
 0x63f   :  { %1186 = vmatprep.subr.bf16.mxu0 %v1236_v5  ;;  %v818_v5 = vld [vmem:[%s1608_s13] sm:$0x7] }
 0x642   :  { %1188 = vmatpush3.bf16.msra.mxu0 %v1187_v17 }
 0x708   :  { %v715_v60 = vpop.f32.mrb[6].mxu0 }
 0x709   :  { %v720_v61 = vsel %vm719_vm5, %v715_v60, 0.0  ;;  %v1115_v62 = vpop.f32.mrb[7].mxu0 }
 0x70a   :  { %721 = vadd.xlane.f32.xlu1 %v720_v61 }
 0x797   :  { %v722_v12 = vpop.xlane.xlu1 %721 }
 0x798   :  { %vm723_vm6 = vcmp.eq.f32.partialorder %v722_v12, 0.0 }
 0x799   :  { %v733_v14 = vsel %vm723_vm6, %v1022_v11, %v715_v60 }
 0x79a   :  { %1125 = vmatmul.mubr.msk.f32.vlgmr.msra.gmra.mrb[10].mxu1 %vm351_vm7, %v733_v14 }
 0x79b   :  { %1128 = vmatpush3.msk.msra.mxu1 %vm168_vm3, %v819_v8  ;;  %1129 = vmatprep.mubr.msk.f32.mxu1 %vm1237_vm1, %v1238_v6  ;;  %v1023_v6 = vld [vmem:[%s1611_s16] ss:$0 sm:$0xff]  ;;  %vm914_vm1 = vcmask 523264   ;;  %vm988_vm3 = vcmask 26624  }
 0x7a2   :  { %1130 = vmatmul.mubr.msk.f32.vlgmr.msra.gmra.mrb[10].mxu1 %vm820_vm10, %v818_v5 }
 0x875   :  { %v893_v19 = vpop.f32.mrb[10].mxu1 }
 0x876   :  { %v1189_v21 = vadd.f32 %v1023_v6, %v893_v19  ;;  %v1131_v22 = vpop.f32.mrb[11].mxu1 }
 0x878   :  { %v898_v24 = vmax.f32 %v1189_v21, 0.0 }
 0x87a   :  { %1149 = vmatmul.mubr.msk.f32.vlgmr.msra.gmra.mrb[8].mxu0 %vm914_vm1, %v898_v24 }
 0x94d   :  { %v984_v26 = vpop.f32.mrb[8].mxu0 }
 0x94e   :  { %v985_v27 = vadd.f32 %v1027_v25, %v984_v26  ;;  %v1150_v28 = vpop.f32.mrb[9].mxu0 }
 0x950   :  { %989 = vst.msk [vmem:[#allocation2] sm:$0x7] %vm988_vm3, %v985_v27 }
 0x951   :  { %1223 = shalt.err (!%p1220_p4)
}
 0x952   :  { %s1224_s20 = scalar_lea.hbm %s1614_s19, 64 }
 0x953   :  { %p1225_p5 = scmp.ne.s32.totalorder %s1614_s19, %s1224_s20  ;;  %p1228_p6 = scmp.lt.u32.totalorder %s1224_s20, %s1614_s19 }
 0x955   :  { %p1230_p7 = pnand %p1228_p6, %p1225_p5 }
 0x957   :  { %1233 = shalt.err (!%p1230_p7)
}
 0x958   :  { %999 = dma.vmem_to_hbm [thread:$0]  %s997_s30, 64, %s1614_s19, [#allocation3]  }
 0x959   :  { %1234 = dma.done.wait [#allocation3], 64  }
 0x95a   :  { %1235 = vsyncadd [#allocation3], 4294967232 }
 0x95b   :  { %1003 = vsyncpa [#allocation3], 1 }

</bundles_post_ra>
